<compile_context>
chip_gen: v7x
topology: tpu7x:2x2x1
jax: 0.10.0
libtpu: 0.0.40
codegen_flags: <defaults>
</compile_context>

<pallas_src>
import functools

import jax
import jax.numpy as jnp
from jax.experimental import pallas as pl
from jax.experimental.pallas import tpu as pltpu

LN_EPS = 1e-5


def _round_up(a, b):
    return (a + b - 1) // b * b


# ---------------------------------------------------------------------------
# One-time, module-level hardware / API detection (keeps the per-call wrapper
# free of host syncs and blanket exception handling).
# ---------------------------------------------------------------------------
def _detect_hw():
    vmem_cap = 64 * 1024 * 1024
    try:
        cap = int(pltpu.get_tpu_info().vmem_capacity_bytes)
        if cap > 0:
            vmem_cap = cap
    except Exception:
        pass
    kind = ""
    try:
        kind = jax.devices()[0].device_kind.lower()
    except Exception:
        pass
    # bf16 VPU path exists on v6e / v7x; keep f32 elementwise on v5e and older.
    bf16_vpu = any(t in kind for t in ("v6", "v7", "7x"))
    # ~96 MiB on v5e/v6e (128 MiB physical), ~48 MiB on v7x (64 MiB physical).
    return int(vmem_cap * 0.75), bf16_vpu


_VMEM_LIMIT_BYTES, _HAS_BF16_VPU = _detect_hw()


def _single_buffer_weights_supported():
    if not hasattr(pl, "Buffered"):
        return False
    try:
        pl.BlockSpec((8, 128), lambda i: (0, 0), pipeline_mode=pl.Buffered(1))
        return True
    except Exception:
        return False


_SINGLE_BUFFER_WEIGHTS = _single_buffer_weights_supported()


# ---------------------------------------------------------------------------
# Kernel
# ---------------------------------------------------------------------------
def _layer_norm(x, gamma, beta, compute_dtype):
    # Two-pass statistics in f32 (matches PyTorch LayerNorm numerics far better
    # than E[x^2]-E[x]^2 for large-mean residual-stream activations); only the
    # affine part runs in compute_dtype (bf16 on v6e/v7x perf path).
    n = x.shape[-1]
    x32 = x.astype(jnp.float32)
    mean = jnp.sum(x32, axis=-1, keepdims=True) * (1.0 / n)
    c = x32 - mean
    var = jnp.sum(c * c, axis=-1, keepdims=True) * (1.0 / n)
    inv = jax.lax.rsqrt(var + LN_EPS)
    cc = c.astype(compute_dtype)
    return (cc * inv.astype(compute_dtype)) * gamma.astype(compute_dtype) \
        + beta.astype(compute_dtype)


def adapter_layer_kernel(
    x_ref,        # (tm, D)   input tokens
    wdn_ref,      # (D, Hp)   down-proj weight (matmul dtype)
    bdn_ref,      # (1, Hp)   down-proj bias (f32)
    wup_ref,      # (Hp, D)   up-proj weight (matmul dtype)
    bup_ref,      # (1, D)    up-proj bias (f32)
    g_pre_ref,    # (1, D)    pre-LN gamma
    b_pre_ref,    # (1, D)    pre-LN beta
    g_post_ref,   # (1, D)    post-LN gamma
    b_post_ref,   # (1, D)    post-LN beta
    o_ref,        # (tm, D)   output
    *,
    pre_ln: bool,
    post_ln: bool,
    matmul_dtype,
    compute_dtype,
):
    x = x_ref[...]

    if pre_ln:
        z = _layer_norm(x, g_pre_ref[...], b_pre_ref[...], compute_dtype)
    else:
        z = x.astype(compute_dtype)

    # down projection (MXU, f32 accumulate) + bias + ReLU.
    # The bias/ReLU work is Hp-wide (cheap) so it stays in f32; the single cast
    # to matmul_dtype below is required for the up-projection anyway.
    h = jnp.dot(z.astype(matmul_dtype), wdn_ref[...],
                preferred_element_type=jnp.float32)
    h = jnp.maximum(h + bdn_ref[...], 0.0)

    # up projection + bias (f32 accumulate; bias add feeds the f32 LN stats).
    u = jnp.dot(h.astype(matmul_dtype), wup_ref[...],
                preferred_element_type=jnp.float32) + bup_ref[...]

    if post_ln:
        u = _layer_norm(u, g_post_ref[...], b_post_ref[...], compute_dtype)
    else:
        u = u.astype(compute_dtype)

    # residual with the un-normalized input; affine/residual/cast in compute_dtype.
    o_ref[...] = (u + x.astype(compute_dtype)).astype(o_ref.dtype)


# ---------------------------------------------------------------------------
# Params: pad bottleneck to a lane-dense multiple of 128 (mathematical no-op
# through ReLU + up-proj) and cast MXU operands ONCE, outside the hot path.
# ---------------------------------------------------------------------------
def prepare_params(params, *, matmul_dtype=jnp.bfloat16, pad_bottleneck=True):
    H = params["w_down"].shape[1]
    Hp = _round_up(H, 128) if pad_bottleneck else H
    w_down, b_down, w_up = params["w_down"], params["b_down"], params["w_up"]
    if Hp != H:
        w_down = jnp.pad(w_down, ((0, 0), (0, Hp - H)))
        b_down = jnp.pad(b_down, ((0, 0), (0, Hp - H)))
        w_up = jnp.pad(w_up, ((0, Hp - H), (0, 0)))
    return {
        "w_down": w_down.astype(matmul_dtype),
        "b_down": b_down.astype(jnp.float32),
        "w_up": w_up.astype(matmul_dtype),
        "b_up": params["b_up"].astype(jnp.float32),
        "g_pre": params["g_pre"].astype(jnp.float32),
        "b_pre": params["b_pre"].astype(jnp.float32),
        "g_post": params["g_post"].astype(jnp.float32),
        "b_post": params["b_post"].astype(jnp.float32),
    }


# ---------------------------------------------------------------------------
# Wrapper
# ---------------------------------------------------------------------------
def adapter_layer(x, params, *, pre_ln=True, post_ln=True, tm=512, compute_dtype=None):
    """x: [B, S, D] -> [B, S, D]. `params` must come from prepare_params()."""
    B, S, D = x.shape
    Hp = params["w_down"].shape[1]
    matmul_dtype = params["w_down"].dtype
    if compute_dtype is None:
        compute_dtype = (
            jnp.bfloat16
            if (matmul_dtype == jnp.bfloat16 and _HAS_BF16_VPU)
            else jnp.float32
        )

    N = B * S
    xf = x.reshape(N, D)  # row-major contiguous reshape: free

    # ---- VMEM-aware token tile -------------------------------------------
    x_bytes = jnp.dtype(x.dtype).itemsize
    w_bytes = jnp.dtype(matmul_dtype).itemsize
    weight_buf = 2 * D * Hp * w_bytes + (Hp + 5 * D) * 4
    weight_resident = weight_buf * (1 if _SINGLE_BUFFER_WEIGHTS else 2)
    # per-token bytes: double-buffered x/out DMA tiles + f32 temporaries
    # (x32, z/u, h) + bf16 casts for the MXU operands.
    per_tok = 4 * D * x_bytes + (3 * D + Hp) * 4 + (D + Hp) * 2
    budget = int(_VMEM_LIMIT_BYTES * 0.85) - weight_resident
    tm_cap = max(8, (budget // max(per_tok, 1)) // 8 * 8)

    # Also cap so the grid has >= ~8 steps: both v7x TensorCores get work and
    # the double-buffer pipeline can amortize prologue/epilogue on all gens.
    tm_steps = _round_up(pl.cdiv(N, 8), 8)
    tm = max(8, min(int(tm), tm_cap, tm_steps))
    tm = (tm // 8) * 8

    grid = (pl.cdiv(N, tm),)  # ragged final block is masked by Pallas

    kernel = functools.partial(
        adapter_layer_kernel,
        pre_ln=pre_ln, post_ln=post_ln,
        matmul_dtype=matmul_dtype, compute_dtype=compute_dtype,
    )

    def const_spec(shape):
        # Constant index_map -> never re-DMA'd; single-buffer when supported.
        if _SINGLE_BUFFER_WEIGHTS:
            return pl.BlockSpec(shape, lambda i: (0, 0), pipeline_mode=pl.Buffered(1))
        return pl.BlockSpec(shape, lambda i: (0, 0))

    in_specs = [
        pl.BlockSpec((tm, D), lambda i: (i, 0)),   # x tokens (pipelined)
        const_spec((D, Hp)),                       # w_down
        const_spec((1, Hp)),                       # b_down
        const_spec((Hp, D)),                       # w_up
        const_spec((1, D)),                        # b_up
        const_spec((1, D)),                        # pre-LN gamma
        const_spec((1, D)),                        # pre-LN beta
        const_spec((1, D)),                        # post-LN gamma
        const_spec((1, D)),                        # post-LN beta
    ]

    out = pl.pallas_call(
        kernel,
        out_shape=jax.ShapeDtypeStruct((N, D), x.dtype),
        grid_spec=pl.GridSpec(
            grid=grid,
            in_specs=in_specs,
            out_specs=pl.BlockSpec((tm, D), lambda i: (i, 0)),
        ),
        compiler_params=pltpu.CompilerParams(
            dimension_semantics=("parallel",),
            vmem_limit_bytes=_VMEM_LIMIT_BYTES,
        ),
    )(
        xf,
        params["w_down"], params["b_down"], params["w_up"], params["b_up"],
        params["g_pre"], params["b_pre"], params["g_post"], params["b_post"],
    )

    return out.reshape(B, S, D)


# ---------------------------------------------------------------------------
# Reference + test harness
# ---------------------------------------------------------------------------
def make_params(key, d_model, bottleneck):
    k1, k2, k3, k4 = jax.random.split(key, 4)
    scale_d = 1.0 / jnp.sqrt(jnp.float32(d_model))
    scale_h = 1.0 / jnp.sqrt(jnp.float32(bottleneck))
    return {
        "w_down": jax.random.normal(k1, (d_model, bottleneck), jnp.float32) * scale_d,
        "b_down": jax.random.normal(k2, (1, bottleneck), jnp.float32) * 0.01,
        "w_up":   jax.random.normal(k3, (bottleneck, d_model), jnp.float32) * scale_h,
        "b_up":   jax.random.normal(k4, (1, d_model), jnp.float32) * 0.01,
        # LayerNorms initialize like PyTorch: weight=1, bias=0
        "g_pre":  jnp.ones((1, d_model), jnp.float32),
        "b_pre":  jnp.zeros((1, d_model), jnp.float32),
        "g_post": jnp.ones((1, d_model), jnp.float32),
        "b_post": jnp.zeros((1, d_model), jnp.float32),
    }


def adapter_layer_ref(x, params, *, pre_ln=True, post_ln=True):
    def ln(v, g, b):
        m = jnp.mean(v, axis=-1, keepdims=True)
        c = v - m
        var = jnp.mean(c * c, axis=-1, keepdims=True)
        return c * jax.lax.rsqrt(var + LN_EPS) * g + b

    z = ln(x, params["g_pre"], params["b_pre"]) if pre_ln else x
    h = jnp.maximum(z @ params["w_down"] + params["b_down"], 0.0)
    u = h @ params["w_up"] + params["b_up"]
    if post_ln:
        u = ln(u, params["g_post"], params["b_post"])
    return u + x


if __name__ == "__main__":
    key = jax.random.PRNGKey(0)
    k_x, k_p = jax.random.split(key)

    B, S, D, H = 2, 8, 32, 16          # batch, seq, d_model, bottleneck
    x = jax.random.normal(k_x, (B, S, D), jnp.float32)
    params = make_params(k_p, D, H)

    ref = adapter_layer_ref(x, params, pre_ln=True, post_ln=True)

    run = jax.jit(functools.partial(adapter_layer, pre_ln=True, post_ln=True))

    # f32 matmul path: tight numerical check vs reference
    p_f32 = prepare_params(params, matmul_dtype=jnp.float32)
    out_f32 = jax.block_until_ready(run(x, p_f32))
    assert out_f32.shape == (B, S, D)
    assert jnp.allclose(out_f32, ref, rtol=1e-3, atol=1e-3), "f32 path mismatch vs reference"

    # bf16 matmul path (perf default on v6e/v7x): looser tolerance from operand rounding
    p_bf16 = prepare_params(params, matmul_dtype=jnp.bfloat16)
    out_bf16 = jax.block_until_ready(run(x, p_bf16))
    assert out_bf16.shape == (B, S, D)
    assert jnp.allclose(out_bf16, ref, rtol=3e-2, atol=3e-2), "bf16 path mismatch vs reference"

    print("KERNEL_OK")
</pallas_src>

<mosaic_0001>
module attributes {stable_mosaic.version = 11 : i64} {
  func.func @adapter_layer_kernel(%arg0: i32, %arg1: memref<8x32xf32, #tpu.memory_space<vmem>>, %arg2: memref<32x128xf32, #tpu.memory_space<vmem>>, %arg3: memref<1x128xf32, #tpu.memory_space<vmem>>, %arg4: memref<128x32xf32, #tpu.memory_space<vmem>>, %arg5: memref<1x32xf32, #tpu.memory_space<vmem>>, %arg6: memref<1x32xf32, #tpu.memory_space<vmem>>, %arg7: memref<1x32xf32, #tpu.memory_space<vmem>>, %arg8: memref<1x32xf32, #tpu.memory_space<vmem>>, %arg9: memref<1x32xf32, #tpu.memory_space<vmem>>, %arg10: memref<8x32xf32, #tpu.memory_space<vmem>>) attributes {dimension_semantics = [#tpu.dimension_semantics<parallel>], iteration_bounds = array<i64: 2>, scalar_prefetch = 0 : i64, scratch_operands = 0 : i64, tpu.core_type = #tpu.core_type<tc>, window_params = [{transform_indices = @transform_0, window_bounds = array<i64: 8, 32>}, {pipeline_mode = #tpu.pipeline_mode<synchronous>, transform_indices = @transform_1, window_bounds = array<i64: 32, 128>}, {pipeline_mode = #tpu.pipeline_mode<synchronous>, transform_indices = @transform_2, window_bounds = array<i64: 1, 128>}, {pipeline_mode = #tpu.pipeline_mode<synchronous>, transform_indices = @transform_3, window_bounds = array<i64: 128, 32>}, {pipeline_mode = #tpu.pipeline_mode<synchronous>, transform_indices = @transform_4, window_bounds = array<i64: 1, 32>}, {pipeline_mode = #tpu.pipeline_mode<synchronous>, transform_indices = @transform_5, window_bounds = array<i64: 1, 32>}, {pipeline_mode = #tpu.pipeline_mode<synchronous>, transform_indices = @transform_6, window_bounds = array<i64: 1, 32>}, {pipeline_mode = #tpu.pipeline_mode<synchronous>, transform_indices = @transform_7, window_bounds = array<i64: 1, 32>}, {pipeline_mode = #tpu.pipeline_mode<synchronous>, transform_indices = @transform_8, window_bounds = array<i64: 1, 32>}, {transform_indices = @transform_9, window_bounds = array<i64: 8, 32>}]} {
    %c0 = arith.constant 0 : index
    %c0_0 = arith.constant 0 : index
    %0 = vector.load %arg1[%c0, %c0_0] : memref<8x32xf32, #tpu.memory_space<vmem>>, vector<8x32xf32>
    %c0_1 = arith.constant 0 : index
    %c0_2 = arith.constant 0 : index
    %1 = vector.load %arg6[%c0_1, %c0_2] : memref<1x32xf32, #tpu.memory_space<vmem>>, vector<1x32xf32>
    %c0_3 = arith.constant 0 : index
    %c0_4 = arith.constant 0 : index
    %2 = vector.load %arg7[%c0_3, %c0_4] : memref<1x32xf32, #tpu.memory_space<vmem>>, vector<1x32xf32>
    %cst = arith.constant dense<0.000000e+00> : vector<8xf32>
    %3 = vector.multi_reduction <add>, %0, %cst [1] : vector<8x32xf32> to vector<8xf32>
    %4 = vector.shape_cast %3 : vector<8xf32> to vector<8x1xf32>
    %cst_5 = arith.constant 3.125000e-02 : f32
    %5 = vector.broadcast %cst_5 : f32 to vector<8x1xf32>
    %6 = arith.mulf %4, %5 : vector<8x1xf32>
    %7 = vector.broadcast %6 : vector<8x1xf32> to vector<8x32xf32>
    %8 = arith.subf %0, %7 : vector<8x32xf32>
    %9 = arith.mulf %8, %8 : vector<8x32xf32>
    %cst_6 = arith.constant dense<0.000000e+00> : vector<8xf32>
    %10 = vector.multi_reduction <add>, %9, %cst_6 [1] : vector<8x32xf32> to vector<8xf32>
    %11 = vector.shape_cast %10 : vector<8xf32> to vector<8x1xf32>
    %cst_7 = arith.constant 3.125000e-02 : f32
    %12 = vector.broadcast %cst_7 : f32 to vector<8x1xf32>
    %13 = arith.mulf %11, %12 : vector<8x1xf32>
    %cst_8 = arith.constant 9.99999974E-6 : f32
    %14 = vector.broadcast %cst_8 : f32 to vector<8x1xf32>
    %15 = arith.addf %13, %14 : vector<8x1xf32>
    %16 = math.rsqrt %15 : vector<8x1xf32>
    %17 = vector.broadcast %16 : vector<8x1xf32> to vector<8x32xf32>
    %18 = arith.mulf %8, %17 : vector<8x32xf32>
    %19 = vector.broadcast %1 : vector<1x32xf32> to vector<8x32xf32>
    %20 = arith.mulf %18, %19 : vector<8x32xf32>
    %21 = vector.broadcast %2 : vector<1x32xf32> to vector<8x32xf32>
    %22 = arith.addf %20, %21 : vector<8x32xf32>
    %c0_9 = arith.constant 0 : index
    %c0_10 = arith.constant 0 : index
    %23 = vector.load %arg2[%c0_9, %c0_10] : memref<32x128xf32, #tpu.memory_space<vmem>>, vector<32x128xf32>
    %cst_11 = arith.constant dense<0.000000e+00> : vector<8x128xf32>
    %24 = tpu.matmul %22, %23, %cst_11 {dimension_numbers = #tpu.dot_dimension_numbers<[1], [0], [0], [1], [0, 0, 1, 1], [], []>} : vector<8x32xf32>, vector<32x128xf32>, vector<8x128xf32> -> vector<8x128xf32>
    %c0_12 = arith.constant 0 : index
    %c0_13 = arith.constant 0 : index
    %25 = vector.load %arg3[%c0_12, %c0_13] : memref<1x128xf32, #tpu.memory_space<vmem>>, vector<1x128xf32>
    %26 = vector.broadcast %25 : vector<1x128xf32> to vector<8x128xf32>
    %27 = arith.addf %24, %26 : vector<8x128xf32>
    %cst_14 = arith.constant 0.000000e+00 : f32
    %28 = vector.broadcast %cst_14 : f32 to vector<8x128xf32>
    %29 = arith.maximumf %27, %28 : vector<8x128xf32>
    %c0_15 = arith.constant 0 : index
    %c0_16 = arith.constant 0 : index
    %30 = vector.load %arg4[%c0_15, %c0_16] : memref<128x32xf32, #tpu.memory_space<vmem>>, vector<128x32xf32>
    %cst_17 = arith.constant dense<0.000000e+00> : vector<8x32xf32>
    %31 = tpu.matmul %29, %30, %cst_17 {dimension_numbers = #tpu.dot_dimension_numbers<[1], [0], [0], [1], [0, 0, 1, 1], [], []>} : vector<8x128xf32>, vector<128x32xf32>, vector<8x32xf32> -> vector<8x32xf32>
    %c0_18 = arith.constant 0 : index
    %c0_19 = arith.constant 0 : index
    %32 = vector.load %arg5[%c0_18, %c0_19] : memref<1x32xf32, #tpu.memory_space<vmem>>, vector<1x32xf32>
    %33 = vector.broadcast %32 : vector<1x32xf32> to vector<8x32xf32>
    %34 = arith.addf %31, %33 : vector<8x32xf32>
    %c0_20 = arith.constant 0 : index
    %c0_21 = arith.constant 0 : index
    %35 = vector.load %arg8[%c0_20, %c0_21] : memref<1x32xf32, #tpu.memory_space<vmem>>, vector<1x32xf32>
    %c0_22 = arith.constant 0 : index
    %c0_23 = arith.constant 0 : index
    %36 = vector.load %arg9[%c0_22, %c0_23] : memref<1x32xf32, #tpu.memory_space<vmem>>, vector<1x32xf32>
    %cst_24 = arith.constant dense<0.000000e+00> : vector<8xf32>
    %37 = vector.multi_reduction <add>, %34, %cst_24 [1] : vector<8x32xf32> to vector<8xf32>
    %38 = vector.shape_cast %37 : vector<8xf32> to vector<8x1xf32>
    %cst_25 = arith.constant 3.125000e-02 : f32
    %39 = vector.broadcast %cst_25 : f32 to vector<8x1xf32>
    %40 = arith.mulf %38, %39 : vector<8x1xf32>
    %41 = vector.broadcast %40 : vector<8x1xf32> to vector<8x32xf32>
    %42 = arith.subf %34, %41 : vector<8x32xf32>
    %43 = arith.mulf %42, %42 : vector<8x32xf32>
    %cst_26 = arith.constant dense<0.000000e+00> : vector<8xf32>
    %44 = vector.multi_reduction <add>, %43, %cst_26 [1] : vector<8x32xf32> to vector<8xf32>
    %45 = vector.shape_cast %44 : vector<8xf32> to vector<8x1xf32>
    %cst_27 = arith.constant 3.125000e-02 : f32
    %46 = vector.broadcast %cst_27 : f32 to vector<8x1xf32>
    %47 = arith.mulf %45, %46 : vector<8x1xf32>
    %cst_28 = arith.constant 9.99999974E-6 : f32
    %48 = vector.broadcast %cst_28 : f32 to vector<8x1xf32>
    %49 = arith.addf %47, %48 : vector<8x1xf32>
    %50 = math.rsqrt %49 : vector<8x1xf32>
    %51 = vector.broadcast %50 : vector<8x1xf32> to vector<8x32xf32>
    %52 = arith.mulf %42, %51 : vector<8x32xf32>
    %53 = vector.broadcast %35 : vector<1x32xf32> to vector<8x32xf32>
    %54 = arith.mulf %52, %53 : vector<8x32xf32>
    %55 = vector.broadcast %36 : vector<1x32xf32> to vector<8x32xf32>
    %56 = arith.addf %54, %55 : vector<8x32xf32>
    %57 = arith.addf %56, %0 : vector<8x32xf32>
    %c0_29 = arith.constant 0 : index
    %c0_30 = arith.constant 0 : index
    %58 = vector.load %arg10[%c0_29, %c0_30] : memref<8x32xf32, #tpu.memory_space<vmem>>, vector<8x32xf32>
    tpu.vector_store %arg10[%c0_29, %c0_30], %57 {strides = array<i32>} : memref<8x32xf32, #tpu.memory_space<vmem>>, vector<8x32xf32>,
    return
  }
  func.func @transform_0(%arg0: i32) -> (i32, i32) {
    %c0_i32 = arith.constant 0 : i32
    %c0_i32_0 = arith.constant 0 : i32
    return %arg0, %c0_i32 : i32, i32
  }
  func.func @transform_1(%arg0: i32) -> (i32, i32) {
    %c0_i32 = arith.constant 0 : i32
    %c0_i32_0 = arith.constant 0 : i32
    %c0_i32_1 = arith.constant 0 : i32
    return %c0_i32, %c0_i32_0 : i32, i32
  }
  func.func @transform_2(%arg0: i32) -> (i32, i32) {
    %c0_i32 = arith.constant 0 : i32
    %c0_i32_0 = arith.constant 0 : i32
    %c0_i32_1 = arith.constant 0 : i32
    return %c0_i32, %c0_i32_0 : i32, i32
  }
  func.func @transform_3(%arg0: i32) -> (i32, i32) {
    %c0_i32 = arith.constant 0 : i32
    %c0_i32_0 = arith.constant 0 : i32
    %c0_i32_1 = arith.constant 0 : i32
    return %c0_i32, %c0_i32_0 : i32, i32
  }
  func.func @transform_4(%arg0: i32) -> (i32, i32) {
    %c0_i32 = arith.constant 0 : i32
    %c0_i32_0 = arith.constant 0 : i32
    %c0_i32_1 = arith.constant 0 : i32
    return %c0_i32, %c0_i32_0 : i32, i32
  }
  func.func @transform_5(%arg0: i32) -> (i32, i32) {
    %c0_i32 = arith.constant 0 : i32
    %c0_i32_0 = arith.constant 0 : i32
    %c0_i32_1 = arith.constant 0 : i32
    return %c0_i32, %c0_i32_0 : i32, i32
  }
  func.func @transform_6(%arg0: i32) -> (i32, i32) {
    %c0_i32 = arith.constant 0 : i32
    %c0_i32_0 = arith.constant 0 : i32
    %c0_i32_1 = arith.constant 0 : i32
    return %c0_i32, %c0_i32_0 : i32, i32
  }
  func.func @transform_7(%arg0: i32) -> (i32, i32) {
    %c0_i32 = arith.constant 0 : i32
    %c0_i32_0 = arith.constant 0 : i32
    %c0_i32_1 = arith.constant 0 : i32
    return %c0_i32, %c0_i32_0 : i32, i32
  }
  func.func @transform_8(%arg0: i32) -> (i32, i32) {
    %c0_i32 = arith.constant 0 : i32
    %c0_i32_0 = arith.constant 0 : i32
    %c0_i32_1 = arith.constant 0 : i32
    return %c0_i32, %c0_i32_0 : i32, i32
  }
  func.func @transform_9(%arg0: i32) -> (i32, i32) {
    %c0_i32 = arith.constant 0 : i32
    %c0_i32_0 = arith.constant 0 : i32
    return %arg0, %c0_i32 : i32, i32
  }
}

</mosaic_0001>

<bundles_post_ra>
// kernel: adapter_layer.1
= control target key start
LH: loop header
LB: loop body
LE: loop exit
PB: predicated region body
PF: predicated region fallthrough
CT: control target
= control target key end

     0   :  { %14 = vsyncpa [#allocation3], 0  ;;  %s1109_s0 = inlined_call_operand.vmem [shape: f32[16,32], index: 0, kind: input, shape index: {}]   ;;  %s1110_s1 = inlined_call_operand.vmem [shape: f32[32,128], index: 1, kind: input, shape index: {}]   ;;  %s1111_s2 = inlined_call_operand.vmem [shape: f32[1,128], index: 2, kind: input, shape index: {}]   ;;  %s1112_s3 = inlined_call_operand.vmem [shape: f32[128,32], index: 3, kind: input, shape index: {}]   ;;  %s1113_s4 = inlined_call_operand.vmem [shape: f32[1,32], index: 4, kind: input, shape index: {}]   ;;  %s1114_s5 = inlined_call_operand.vmem [shape: f32[1,32], index: 5, kind: input, shape index: {}]   ;;  %s1115_s6 = inlined_call_operand.vmem [shape: f32[1,32], index: 6, kind: input, shape index: {}]   ;;  %s1116_s7 = inlined_call_operand.vmem [shape: f32[1,32], index: 7, kind: input, shape index: {}]   ;;  %s1117_s8 = inlined_call_operand.vmem [shape: f32[1,32], index: 8, kind: input, shape index: {}]   ;;  %s1118_s9 = inlined_call_operand.hbm [shape: f32[16,32], index: 9, kind: output, shape index: {}]  }
   0x1   :  { %16 = vsyncpa [#allocation3 + $0x1], 0  ;;  %s920_s30 = smov 0   ;;  %s922_s10 = smov 0  }
   0x2   :  { %s924_s11 = smov 0   ;;  %s926_s12 = smov 0  }
   0x3 LB: > { %s941_s13 = sadd.s32 4294967295, %s864_s12   ;;  %s641_s14 = sadd.s32 4294967294, %s864_s12   ;;  %s864_s12 = sphi %s926_s12, %s1124_s12   ;;  %s860_s11 = sphi %s924_s11, %s1123_s11   ;;  %s856_s10 = sphi %s922_s10, %s1122_s10   ;;  %s852_s30 = sphi %s920_s30, %s1121_s30  }
   0x4   : > { %s945_s15 = sadd.s32 1, %s864_s12   ;;  %s223_s16 = sadd.s32 1, %s860_s11 }
   0x5   : > { %s220_s17 = ssub.s32 %s864_s12, %s945_s15  ;;  %p233_p0 = scmp.ne.s32.totalorder %s860_s11, %s856_s10 }
   0x6   : > { %p221_p1 = scmp.eq.s32.totalorder %s220_s17, 0  ;;  %p234_p2 = scmp.eq.s32.totalorder %s941_s13, 1 }
   0x7   : > { %p239_p3 = scmp.ne.s32.totalorder %s856_s10, %s852_s30  ;;  %p240_p4 = scmp.eq.s32.totalorder %s641_s14, 1 }
   0x8   : > { %s956_s18 = scalar_select %p221_p1, %s860_s11, %s223_s16  }
   0x9   : > { %p958_p5 = por %p234_p2, %p233_p0  ;;  %p962_p6 = por %p240_p4, %p239_p3 }
   0xa   : > { %p644_p7 = scmp.ge.s32.totalorder %s864_s12, 1  ;;  %p289_p8 = scmp.lt.s32.totalorder %s864_s12, 3 }
   0xc   : > { %p290_p9 = pnand %p644_p7, %p289_p8 }
   0xd   : > { %p324_p10 = scmp.lt.s32.totalorder (!%p290_p9), %s941_s13, 1  ;;  %vm331_vm0 = vcmask (!%p290_p9), 261120   ;;  %v359_v7 = vld [vmem:[%s1110_s1] sm:$0xff] (!%p290_p9)  ;;  %v360_v8 = vld [vmem:[%s1110_s1 + $0x8] sm:$0xff] (!%p290_p9)  ;;  %v361_v9 = vld [vmem:[%s1110_s1 + $0x10] sm:$0xff] (!%p290_p9)  ;;  %v866_v10 = vmov (!%p290_p9), 0.0|0.0  }
   0xe   : > { %293 = sbr.rel (%p290_p9) target bundleno = 1098 (0x44a), region = 56  ;;  %726 = vmatprep.subr.bf16.mxu0 (!%p290_p9), %v866_v10  ;;  %v727_v11 = vpack.c.bf16 (!%p290_p9), %v360_v8, %v359_v7  ;;  %v362_v12 = vld [vmem:[%s1110_s1 + $0x18] sm:$0xff] (!%p290_p9)  ;;  %vm867_vm1 = vmmov (!%p290_p9), 0   ;;  %v868_v13 = vmov (!%p290_p9), 0.0   ;;  %732 = vmatprep.subr.bf16.mxu1 (!%p290_p9), %v866_v10  ;;  %v444_v15 = vld [vmem:[%s1112_s3] sm:$0xff] (!%p290_p9)  ;;  %v445_v16 = vld [vmem:[%s1112_s3 + $0x8] sm:$0xff] (!%p290_p9) }
   0xf   : > { %688 = vmatprep.mubr.msk.f32.mxu0 (!%p290_p9), %vm867_vm1, %v868_v13  ;;  %723 = vmatprep.mubr.msk.f32.mxu1 (!%p290_p9), %vm867_vm1, %v868_v13  ;;  %v730_v14 = vpack.c.bf16 (!%p290_p9), %v362_v12, %v361_v9  ;;  %v446_v17 = vld [vmem:[%s1112_s3 + $0x10] sm:$0xff] (!%p290_p9)  ;;  %v733_v18 = vpack.c.bf16 (!%p290_p9), %v445_v16, %v444_v15  ;;  %v447_v19 = vld [vmem:[%s1112_s3 + $0x18] sm:$0xff] (!%p290_p9)  ;;  %v448_v21 = vld [vmem:[%s1112_s3 + $0x20] sm:$0xff] (!%p290_p9)  ;;  %s321_s26 = sand.u32 (!%p290_p9), 1, %s856_s10   ;;  %s655_s17 = sshll.u32 (!%p290_p9), %s941_s13, 7 }
  0x10   : > { %728 = vmatpush3.bf16.msra.mxu0 (!%p290_p9), %v727_v11  ;;  %v736_v20 = vpack.c.bf16 (!%p290_p9), %v447_v19, %v446_v17  ;;  %v449_v22 = vld [vmem:[%s1112_s3 + $0x28] sm:$0xff] (!%p290_p9)  ;;  %v450_v24 = vld [vmem:[%s1112_s3 + $0x30] sm:$0xff] (!%p290_p9)  ;;  %v451_v25 = vld [vmem:[%s1112_s3 + $0x38] sm:$0xff] (!%p290_p9)  ;;  %s645_s27 = sshll.u32 (!%p290_p9), %s321_s26, 3  ;;  %s569_s28 = scalar_lea.sflag (!%p290_p9), [#allocation3], %s321_s26 }
  0x11   : > { %729 = vmatprep.subr.bf16.mxu0 (!%p290_p9), %v866_v10  ;;  %734 = vmatpush3.bf16.msra.mxu1 (!%p290_p9), %v733_v18  ;;  %v739_v23 = vpack.c.bf16 (!%p290_p9), %v449_v22, %v448_v21  ;;  %v742_v26 = vpack.c.bf16 (!%p290_p9), %v451_v25, %v450_v24  ;;  %v452_v27 = vld [vmem:[%s1112_s3 + $0x40] sm:$0xff] (!%p290_p9)  ;;  %v453_v28 = vld [vmem:[%s1112_s3 + $0x48] sm:$0xff] (!%p290_p9)  ;;  %v454_v30 = vld [vmem:[%s1112_s3 + $0x50] sm:$0xff] (!%p290_p9) }
  0x12   : > { %735 = vmatprep.subr.bf16.mxu1 (!%p290_p9), %v866_v10  ;;  %v745_v29 = vpack.c.bf16 (!%p290_p9), %v453_v28, %v452_v27  ;;  %v455_v31 = vld [vmem:[%s1112_s3 + $0x58] sm:$0xff] (!%p290_p9)  ;;  %v456_v33 = vld [vmem:[%s1112_s3 + $0x60] sm:$0xff] (!%p290_p9)  ;;  %v457_v34 = vld [vmem:[%s1112_s3 + $0x68] sm:$0xff] (!%p290_p9) }
  0x13   : > { %v748_v32 = vpack.c.bf16 (!%p290_p9), %v455_v31, %v454_v30  ;;  %v751_v35 = vpack.c.bf16 (!%p290_p9), %v457_v34, %v456_v33  ;;  %v647_v40 = vld [vmem:[%s1114_s5] ss:$0 sm:$0xff] (!%p290_p9)  ;;  %v458_v45 = vld [vmem:[%s1112_s3 + $0x70] sm:$0xff] (!%p290_p9)  ;;  %v459_v46 = vld [vmem:[%s1112_s3 + $0x78] sm:$0xff] (!%p290_p9) }
  0x14   : > { %731 = vmatpush3.bf16.msra.mxu0 (!%p290_p9), %v730_v14  ;;  %v648_v42 = vld [vmem:[%s1115_s6] ss:$0 sm:$0xff] (!%p290_p9)  ;;  %v754_v47 = vpack.c.bf16 (!%p290_p9), %v459_v46, %v458_v45 }
  0x15   : > { %s325_s21 = scalar_select %p324_p10, %s941_s13, 1  ;;  %737 = vmatpush3.bf16.msra.mxu1 %v736_v20  ;;  %v649_v48 = vld [vmem:[%s1111_s2] ss:$0 sm:$0xff] }
  0x16   : > { %738 = vmatprep.subr.bf16.mxu1 %v866_v10  ;;  %v651_v53 = vld [vmem:[%s1113_s4] ss:$0 sm:$0xff]  ;;  %s869_s13 = smov [#allocation2]  }
  0x17   : > { %s646_s22 = sshll.u32 %s325_s21, 3  ;;  %s323_s21 = scalar_lea.vmem [#allocation2], %s645_s27 }
  0x18   : > { %s327_s25 = scalar_lea.vmem %s1109_s0, %s646_s22  ;;  %s582_s22 = sshll.u32 %s323_s21, 4  ;;  %s1068_s22 = int_to_ptr.vmem [resolvable:$true] %s582_s22 }
  0x19   : > { %v973_v0 = vld [vmem:[%s327_s25] sm:$0xff]  ;;  %740 = vmatpush3.bf16.msra.mxu1 %v739_v23  ;;  %s1066_s25 = scalar_lea.hbm %s1118_s9, %s655_s17  ;;  %s802_s29 = scalar_lea.vmem %s1068_s22, 128 }
  0x1a   : > { %v332_v1 = vsel %vm331_vm0, %v973_v0, 0.0  ;;  %741 = vmatprep.subr.bf16.mxu1 %v866_v10  ;;  %p803_p11 = scmp.ne.s32.totalorder %s1068_s22, %s802_s29  ;;  %s806_s27 = sshll.u32 %s869_s13, 4  ;;  %s807_s27 = int_to_ptr.vmem [resolvable:$false] %s806_s27 }
  0x1b   : > { %333 = vadd.xlane.f32.xlu0 %v332_v1  ;;  %s808_s14 = scalar_lea.vmem %s807_s27, 256  ;;  %p809_p0 = scmp.lt.s32.totalorder %s1068_s22, %s807_s27 }
  0x1c   : > { %p804_p12 = pnand %p803_p11, %p958_p5  ;;  %p810_p1 = scmp.lt.s32.totalorder %s808_s14, %s802_s29 }
  0x1d   : > { %743 = vmatpush3.bf16.msra.mxu1 %v742_v26 }
  0x1e   : > { %744 = vmatprep.subr.bf16.mxu1 %v866_v10  ;;  %p805_p13 = pneg %p804_p12  ;;  %p811_p2 = por %p810_p1, %p809_p0 }
  0x20   : > { %p812_p3 = pnand %p811_p2, %p805_p13 }
  0x21   : > { %746 = vmatpush3.bf16.msra.mxu1 %v745_v29 }
  0x22   : > { %747 = vmatprep.subr.bf16.mxu1 %v866_v10 }
  0x25   : > { %749 = vmatpush3.bf16.msra.mxu1 %v748_v32 }
  0x26   : > { %750 = vmatprep.subr.bf16.mxu1 %v866_v10 }
  0x29   : > { %752 = vmatpush3.bf16.msra.mxu1 %v751_v35 }
  0x2a   : > { %753 = vmatprep.subr.bf16.mxu1 %v866_v10 }
  0x2d   : > { %755 = vmatpush3.bf16.msra.mxu1 %v754_v47 }
  0xa8   : > { %v334_v2 = vpop.xlane.xlu0 %333 }
  0xa9   : > { %v335_v3 = vmul.f32 0.03125, %v334_v2 }
  0xab   : > { %v336_v4 = vsub.f32 %v973_v0, %v335_v3 }
  0xad   : > { %v337_v5 = vmul.f32 %v336_v4, %v336_v4 }
  0xaf   : > { %v338_v6 = vsel %vm331_vm0, %v337_v5, 0.0 }
  0xb0   : > { %339 = vadd.xlane.f32.xlu0 %v338_v6  ;;  %v653_v6 = vld [vmem:[%s1117_s8] ss:$0 sm:$0xff] }
 0x13d   : > { %v340_v36 = vpop.xlane.xlu0 %339 }
 0x13e   : > { %v341_v37 = vmul.f32 0.03125, %v340_v36 }
 0x140   : > { %v342_v38 = vadd.f32 1e-05, %v341_v37 }
 0x142   : > { %798 = vrsqrt.f32 %v342_v38 }
 0x14c   : > { %v799_v39 = vpop.eup %798 }
 0x14d   : > { %v344_v41 = vmul.f32 %v799_v39, %v336_v4  ;;  %v652_v4 = vld [vmem:[%s1116_s7] ss:$0 sm:$0xff] }
 0x14f   : > { %v351_v43 = vmul.f32 %v647_v40, %v344_v41 }
 0x151   : > { %v358_v44 = vadd.f32 %v648_v42, %v351_v43 }
 0x153   : > { %689 = vmatmul.mubr.msk.f32.vlgmr.msra.gmra.mrb[0].mxu0 %vm331_vm0, %v358_v44 }
 0x226   : > { %v439_v49 = vpop.f32.mrb[0].mxu0 }
 0x227   : > { %v440_v50 = vadd.f32 %v649_v48, %v439_v49  ;;  %v690_v51 = vpop.f32.mrb[1].mxu0 }
 0x229   : > { %v443_v52 = vmax.f32 %v440_v50, 0.0 }
 0x22b   : > { %724 = vmatmul.mubr.f32.vlgmr.msra.gmra.mrb[0].mxu1 %v443_v52 }
 0x2fe   : > { %v533_v54 = vpop.f32.mrb[0].mxu1 }
 0x2ff   : > { %v534_v55 = vadd.f32 %v651_v53, %v533_v54  ;;  %v725_v56 = vpop.f32.mrb[1].mxu1 }
 0x301   : > { %v539_v57 = vsel %vm331_vm0, %v534_v55, 0.0 }
 0x302   : > { %540 = vadd.xlane.f32.xlu1 %v539_v57 }
 0x38f   : > { %v541_v58 = vpop.xlane.xlu1 %540 }
 0x390   : > { %v542_v59 = vmul.f32 0.03125, %v541_v58 }
 0x392   : > { %v543_v60 = vsub.f32 %v534_v55, %v542_v59 }
 0x394   : > { %v544_v61 = vmul.f32 %v543_v60, %v543_v60 }
 0x396   : > { %v545_v62 = vsel %vm331_vm0, %v544_v61, 0.0 }
 0x397   : > { %546 = vadd.xlane.f32.xlu1 %v545_v62 }
 0x424   : > { %v547_v63 = vpop.xlane.xlu1 %546 }
 0x425   : > { %v548_v1 = vmul.f32 0.03125, %v547_v63 }
 0x427   : > { %v549_v2 = vadd.f32 1e-05, %v548_v1 }
 0x429   : > { %800 = vrsqrt.f32 %v549_v2 }
 0x433   : > { %v801_v3 = vpop.eup %800 }
 0x434   : > { %v551_v5 = vmul.f32 %v801_v3, %v543_v60 }
 0x436   : > { %v558_v7 = vmul.f32 %v652_v4, %v551_v5 }
 0x438   : > { %v565_v8 = vadd.f32 %v653_v6, %v558_v7 }
 0x43a   : > { %v566_v9 = vadd.f32 %v565_v8, %v973_v0 }
 0x43c   : > { %567 = vst.msk [vmem:[%s323_s21] sm:$0xff] %vm331_vm0, %v566_v9 }
 0x43d   : > { %815 = shalt.err (!%p812_p3)
}
 0x43e   : > { %s816_s26 = scalar_lea.hbm %s1066_s25, 128  ;;  %s820_s21 = scalar_lea.hbm %s1118_s9, 256 }
 0x43f   : > { %p817_p4 = scmp.ne.s32.totalorder %s1066_s25, %s816_s26  ;;  %p821_p9 = scmp.lt.u32.totalorder %s1066_s25, %s1118_s9 }
 0x440   : > { %p822_p10 = scmp.lt.u32.totalorder %s820_s21, %s816_s26  ;;  %p824_p12 = scmp.lt.u32.totalorder %s816_s26, %s1066_s25 }
 0x441   : > { %p818_p7 = pnand %p817_p4, %p958_p5 }
 0x442   : > { %p823_p11 = por %p822_p10, %p821_p9 }
 0x443   : > { %p819_p8 = pneg %p818_p7 }
 0x444   : > { %p825_p13 = por %p824_p12, %p823_p11 }
 0x446   : > { %p826_p0 = pnand %p825_p13, %p819_p8 }
 0x448   : > { %829 = shalt.err (!%p826_p0)
}
 0x449   : > { %756 = dma.vmem_to_hbm [thread:$0]  (%p958_p5), %s1068_s22, 128, %s1066_s25, %s569_s28  }
 0x44a PF: > { %p762_p1 = scmp.ge.s32.totalorder %s864_s12, 2  ;;  %s594_s29 = sand.u32 1, %s852_s30  }
 0x44b   : > { %s595_s13 = scalar_lea.sflag [#allocation3], %s594_s29 }
 0x44c   : > { %p759_p2 = pnand %p762_p1, %p962_p6 }
 0x44e   : > { %847 = dma.done.wait (!%p759_p2), %s595_s13, 128  }
 0x44f   : > { %849 = vsyncadd (!%p759_p2), %s595_s13, 4294967168  ;;  %p19_p3 = scmp.ge.s32.totalorder %s945_s15, 4   ;;  %s1121_s30 = smov %s856_s10 }
 0x450   : > { %s1122_s10 = smov %s860_s11  ;;  %s1123_s11 = smov %s956_s18 }
 0x451   : > { %s1124_s12 = smov %s945_s15  ;;  %21 = sbr.rel (!%p19_p3) target bundleno = 3 (0x3), region = 91 }
 0x458   :  { %600 = vsyncpa [#allocation3], 1 }
 0x459   :  { %602 = vsyncpa [#allocation3 + $0x1], 1 }

</bundles_post_ra>
